<compile_context>
chip_gen: v7x
topology: tpu7x:2x2x1
jax: 0.10.0
libtpu: 0.0.40
codegen_flags: <defaults>
</compile_context>

<pallas_src>
import functools

import jax
import jax.numpy as jnp
from jax.experimental import pallas as pl
from jax.experimental.pallas import tpu as pltpu

ALPHA = 0.3
BETA = 0.7
SMOOTH = 1e-05

_LANES = 128


def _round_up(x, m):
    return ((x + m - 1) // m) * m


def _cdiv(a, b):
    return -(-a // b)


def _sublane_multiple(dtype):
    # f32 -> 8, bf16 -> 16, int8/bool -> 32 (sub-32-bit dtypes pack along sublanes).
    return max(8, 32 // jnp.dtype(dtype).itemsize)


def _tversky_kernel(p_ref, g_ref, out_ref, tp_acc, w_acc, *, hw, tk):
    # p_ref, g_ref: (TM, TK) tiles in VMEM.
    # out_ref:      (TM, 1) per-row tversky values (written on the last k step).
    # tp_acc:       (TM, 128) per-lane partial sum of p*g               (f32)
    # w_acc:        (TM, 128) per-lane partial sum of ALPHA*p + BETA*g  (f32)
    k = pl.program_id(1)
    nk = pl.num_programs(1)

    @pl.when(k == 0)
    def _init():
        tp_acc[...] = jnp.zeros_like(tp_acc)
        w_acc[...] = jnp.zeros_like(w_acc)

    # Ragged tail handling: the true HW extent is `hw`; the last k-block may
    # overrun it (no HBM padding is done), so its overrun columns are masked.
    rem = hw % tk  # static Python int
    if rem:
        valid = jnp.where(k == nk - 1, rem, tk).astype(jnp.int32)
        lane = jax.lax.broadcasted_iota(jnp.int32, (p_ref.shape[0], _LANES), 1)

    # Per-128-lane chunk: slice the refs directly (keeps intermediates at
    # (TM, 128)) and accumulate into the VMEM scratch each chunk so live ranges
    # stay bounded. All of this hides comfortably under the per-chunk DMA time.
    n_chunks = tk // _LANES
    for c in range(n_chunks):
        sl = pl.ds(c * _LANES, _LANES)
        pc = p_ref[:, sl].astype(jnp.float32)
        gc = g_ref[:, sl].astype(jnp.float32)
        if rem and (c + 1) * _LANES > rem:  # chunk may contain out-of-bounds cols
            m = lane < (valid - c * _LANES)
            pc = jnp.where(m, pc, 0.0)
            gc = jnp.where(m, gc, 0.0)
        tp_acc[...] += pc * gc
        w_acc[...] += ALPHA * pc + BETA * gc

    @pl.when(k == nk - 1)
    def _finalize():
        tp = jnp.sum(tp_acc[...], axis=-1, keepdims=True)  # (TM, 1)
        w = jnp.sum(w_acc[...], axis=-1, keepdims=True)
        # FP = sum(p) - TP, FN = sum(g) - TP  =>
        # denom = TP + a*FP + b*FN = TP*(1-a-b) + a*sum(p) + b*sum(g) = TP*(1-a-b) + W
        denom = tp * (1.0 - ALPHA - BETA) + w
        out_ref[...] = (tp + SMOOTH) / (denom + SMOOTH)


@functools.partial(jax.jit, static_argnames=("tm", "tk", "target_step_bytes"))
def tversky_loss(p, g, *, tm=128, tk=None, target_step_bytes=8 * 1024 * 1024):
    """p, g: (N, C, H, W) arrays. Returns scalar float32 loss."""
    N, C, H, W = p.shape
    assert g.shape == p.shape
    # Reference does `g = 1.0 * g`; promote non-float masks (bool/int) so the
    # kernel only sees float data with sane sublane packing.
    if not jnp.issubdtype(g.dtype, jnp.floating):
        g = g.astype(jnp.float32)

    nc, hw = N * C, H * W
    p2 = p.reshape(nc, hw)
    g2 = g.reshape(nc, hw)

    isize = p2.dtype.itemsize + g2.dtype.itemsize
    sub = max(_sublane_multiple(p2.dtype), _sublane_multiple(g2.dtype))
    hw_lanes = _round_up(hw, _LANES)

    # Row tile: sublane-aligned, never HBM-padded. Keep >= 2 row-blocks when
    # possible so the "parallel" axis can feed both v7x TensorCores.
    tm_eff = _round_up(min(tm, _round_up(nc, sub)), sub)
    while tm_eff > sub and _cdiv(nc, tm_eff) < 2:
        tm_eff = max(sub, _round_up(tm_eff // 2, sub))

    if tk is None:
        # Column tile: target ~8 MiB of input per grid step so the ~0.35us fixed
        # step cost stays small even at v7x bandwidth, while the double-buffered
        # footprint (~16 MiB) + scratch stays well under the 32 MiB VMEM limit.
        tk_eff = max(_LANES, (target_step_bytes // max(tm_eff * isize, 1)) // _LANES * _LANES)
        tk_eff = min(tk_eff, hw_lanes)
        if tk_eff == hw_lanes:
            # HW is the limiter (small spatial, large NC): grow the row tile
            # instead, bounded by the byte target and by keeping two row-blocks.
            step_bytes = tm_eff * tk_eff * isize
            if step_bytes < target_step_bytes:
                grow = max(1, target_step_bytes // step_bytes)
                tm_cap = _round_up(nc, sub)
                tm_max = tm_cap if nc <= 2 * sub else _round_up(_cdiv(nc, 2), sub)
                tm_eff = max(tm_eff, min(_round_up(tm_eff * grow, sub), tm_max))
    else:
        tk_eff = min(_round_up(tk, _LANES), hw_lanes)

    grid = (_cdiv(nc, tm_eff), _cdiv(hw, tk_eff))
    kernel = functools.partial(_tversky_kernel, hw=hw, tk=tk_eff)

    per_row = pl.pallas_call(
        kernel,
        out_shape=jax.ShapeDtypeStruct((nc, 1), jnp.float32),
        grid_spec=pltpu.PrefetchScalarGridSpec(
            num_scalar_prefetch=0,
            grid=grid,
            in_specs=[
                pl.BlockSpec((tm_eff, tk_eff), lambda i, k: (i, k)),
                pl.BlockSpec((tm_eff, tk_eff), lambda i, k: (i, k)),
            ],
            out_specs=pl.BlockSpec((tm_eff, 1), lambda i, k: (i, 0)),
            scratch_shapes=[
                pltpu.VMEM((tm_eff, _LANES), jnp.float32),
                pltpu.VMEM((tm_eff, _LANES), jnp.float32),
            ],
        ),
        compiler_params=pltpu.CompilerParams(
            dimension_semantics=("parallel", "arbitrary"),
            vmem_limit_bytes=32 * 1024 * 1024,
        ),
    )(p2, g2)

    # Tiny final reduction (NC elements) in plain JAX.
    return (1.0 - jnp.mean(per_row[:, 0])).astype(jnp.float32)


def _tversky_loss_ref(p, g):
    # Pure-JAX reference mirroring the PyTorch module (nDims=2, batchTversky=False).
    dims = (2, 3)
    g = 1.0 * g
    tp = jnp.sum(p * g, axis=dims)
    fp = jnp.sum(p * (1 - g), axis=dims)
    fn = jnp.sum((1 - p) * g, axis=dims)
    tversky = jnp.mean((tp + SMOOTH) / (tp + ALPHA * fp + BETA * fn + SMOOTH))
    return 1.0 - tversky


if __name__ == "__main__":
    key = jax.random.PRNGKey(0)
    kp, kg, kp2, kg2 = jax.random.split(key, 4)

    # Primary check: shapes that tile exactly.
    N, C, H, W = 2, 4, 16, 16
    p = jax.nn.sigmoid(jax.random.normal(kp, (N, C, H, W), dtype=jnp.float32))
    g = (jax.random.uniform(kg, (N, C, H, W)) > 0.5).astype(jnp.float32)
    loss = tversky_loss(p, g)
    jax.block_until_ready(loss)
    ref = _tversky_loss_ref(p, g)
    assert jnp.allclose(loss, ref, atol=1e-5, rtol=1e-5), (loss, ref)

    # Secondary check: ragged spatial size (H*W=130) exercising the in-kernel
    # tail-column mask (no HBM padding copies) across two k-blocks.
    N2, C2, H2, W2 = 2, 4, 10, 13
    p_r = jax.nn.sigmoid(jax.random.normal(kp2, (N2, C2, H2, W2), dtype=jnp.float32))
    g_r = (jax.random.uniform(kg2, (N2, C2, H2, W2)) > 0.5).astype(jnp.float32)
    loss_r = tversky_loss(p_r, g_r, tk=128)
    jax.block_until_ready(loss_r)
    ref_r = _tversky_loss_ref(p_r, g_r)
    assert jnp.allclose(loss_r, ref_r, atol=1e-5, rtol=1e-5), (loss_r, ref_r)

    print("KERNEL_OK")
</pallas_src>

<mosaic_0001>
module attributes {stable_mosaic.version = 11 : i64} {
  func.func @_tversky_kernel(%arg0: i32, %arg1: i32, %arg2: memref<8x256xf32, #tpu.memory_space<vmem>>, %arg3: memref<8x256xf32, #tpu.memory_space<vmem>>, %arg4: memref<8x1xf32, #tpu.memory_space<vmem>>, %arg5: memref<8x128xf32, #tpu.memory_space<vmem>>, %arg6: memref<8x128xf32, #tpu.memory_space<vmem>>) attributes {dimension_semantics = [#tpu.dimension_semantics<parallel>, #tpu.dimension_semantics<arbitrary>], iteration_bounds = array<i64: 1, 1>, scalar_prefetch = 0 : i64, scratch_operands = 2 : i64, tpu.core_type = #tpu.core_type<tc>, window_params = [{transform_indices = @transform_0, window_bounds = array<i64: 8, 256>}, {transform_indices = @transform_1, window_bounds = array<i64: 8, 256>}, {transform_indices = @transform_2, window_bounds = array<i64: 8, 1>}]} {
    %c0_i32 = arith.constant 0 : i32
    %0 = arith.cmpi eq, %arg1, %c0_i32 : i32
    %1 = arith.extui %0 : i1 to i32
    %c0_i32_0 = arith.constant 0 : i32
    %2 = arith.cmpi ne, %1, %c0_i32_0 : i32
    scf.if %2 {
      %cst_28 = arith.constant 0.000000e+00 : f32
      %34 = vector.broadcast %cst_28 : f32 to vector<8x128xf32>
      %c0_29 = arith.constant 0 : index
      %c0_30 = arith.constant 0 : index
      %35 = vector.load %arg5[%c0_29, %c0_30] : memref<8x128xf32, #tpu.memory_space<vmem>>, vector<8x128xf32>
      tpu.vector_store %arg5[%c0_29, %c0_30], %34 {strides = array<i32>} : memref<8x128xf32, #tpu.memory_space<vmem>>, vector<8x128xf32>,
      %cst_31 = arith.constant 0.000000e+00 : f32
      %36 = vector.broadcast %cst_31 : f32 to vector<8x128xf32>
      %c0_32 = arith.constant 0 : index
      %c0_33 = arith.constant 0 : index
      %37 = vector.load %arg6[%c0_32, %c0_33] : memref<8x128xf32, #tpu.memory_space<vmem>>, vector<8x128xf32>
      tpu.vector_store %arg6[%c0_32, %c0_33], %36 {strides = array<i32>} : memref<8x128xf32, #tpu.memory_space<vmem>>, vector<8x128xf32>,
    } else {
    }
    %c0 = arith.constant 0 : index
    %c0_1 = arith.constant 0 : index
    %3 = vector.load %arg2[%c0, %c0_1] : memref<8x256xf32, #tpu.memory_space<vmem>>, vector<8x128xf32>
    %c0_2 = arith.constant 0 : index
    %c0_3 = arith.constant 0 : index
    %4 = vector.load %arg3[%c0_2, %c0_3] : memref<8x256xf32, #tpu.memory_space<vmem>>, vector<8x128xf32>
    %c0_4 = arith.constant 0 : index
    %c0_5 = arith.constant 0 : index
    %5 = vector.load %arg5[%c0_4, %c0_5] : memref<8x128xf32, #tpu.memory_space<vmem>>, vector<8x128xf32>
    %6 = arith.mulf %3, %4 : vector<8x128xf32>
    %7 = arith.addf %5, %6 : vector<8x128xf32>
    %c0_6 = arith.constant 0 : index
    %c0_7 = arith.constant 0 : index
    %8 = vector.load %arg5[%c0_6, %c0_7] : memref<8x128xf32, #tpu.memory_space<vmem>>, vector<8x128xf32>
    tpu.vector_store %arg5[%c0_6, %c0_7], %7 {strides = array<i32>} : memref<8x128xf32, #tpu.memory_space<vmem>>, vector<8x128xf32>,
    %c0_8 = arith.constant 0 : index
    %c0_9 = arith.constant 0 : index
    %9 = vector.load %arg6[%c0_8, %c0_9] : memref<8x128xf32, #tpu.memory_space<vmem>>, vector<8x128xf32>
    %cst = arith.constant 3.000000e-01 : f32
    %10 = vector.broadcast %cst : f32 to vector<8x128xf32>
    %11 = arith.mulf %10, %3 : vector<8x128xf32>
    %cst_10 = arith.constant 0.699999988 : f32
    %12 = vector.broadcast %cst_10 : f32 to vector<8x128xf32>
    %13 = arith.mulf %12, %4 : vector<8x128xf32>
    %14 = arith.addf %11, %13 : vector<8x128xf32>
    %15 = arith.addf %9, %14 : vector<8x128xf32>
    %c0_11 = arith.constant 0 : index
    %c0_12 = arith.constant 0 : index
    %16 = vector.load %arg6[%c0_11, %c0_12] : memref<8x128xf32, #tpu.memory_space<vmem>>, vector<8x128xf32>
    tpu.vector_store %arg6[%c0_11, %c0_12], %15 {strides = array<i32>} : memref<8x128xf32, #tpu.memory_space<vmem>>, vector<8x128xf32>,
    %c0_13 = arith.constant 0 : index
    %c128 = arith.constant 128 : index
    %17 = vector.load %arg2[%c0_13, %c128] : memref<8x256xf32, #tpu.memory_space<vmem>>, vector<8x128xf32>
    %c0_14 = arith.constant 0 : index
    %c128_15 = arith.constant 128 : index
    %18 = vector.load %arg3[%c0_14, %c128_15] : memref<8x256xf32, #tpu.memory_space<vmem>>, vector<8x128xf32>
    %c0_16 = arith.constant 0 : index
    %c0_17 = arith.constant 0 : index
    %19 = vector.load %arg5[%c0_16, %c0_17] : memref<8x128xf32, #tpu.memory_space<vmem>>, vector<8x128xf32>
    %20 = arith.mulf %17, %18 : vector<8x128xf32>
    %21 = arith.addf %19, %20 : vector<8x128xf32>
    %c0_18 = arith.constant 0 : index
    %c0_19 = arith.constant 0 : index
    %22 = vector.load %arg5[%c0_18, %c0_19] : memref<8x128xf32, #tpu.memory_space<vmem>>, vector<8x128xf32>
    tpu.vector_store %arg5[%c0_18, %c0_19], %21 {strides = array<i32>} : memref<8x128xf32, #tpu.memory_space<vmem>>, vector<8x128xf32>,
    %c0_20 = arith.constant 0 : index
    %c0_21 = arith.constant 0 : index
    %23 = vector.load %arg6[%c0_20, %c0_21] : memref<8x128xf32, #tpu.memory_space<vmem>>, vector<8x128xf32>
    %cst_22 = arith.constant 3.000000e-01 : f32
    %24 = vector.broadcast %cst_22 : f32 to vector<8x128xf32>
    %25 = arith.mulf %24, %17 : vector<8x128xf32>
    %cst_23 = arith.constant 0.699999988 : f32
    %26 = vector.broadcast %cst_23 : f32 to vector<8x128xf32>
    %27 = arith.mulf %26, %18 : vector<8x128xf32>
    %28 = arith.addf %25, %27 : vector<8x128xf32>
    %29 = arith.addf %23, %28 : vector<8x128xf32>
    %c0_24 = arith.constant 0 : index
    %c0_25 = arith.constant 0 : index
    %30 = vector.load %arg6[%c0_24, %c0_25] : memref<8x128xf32, #tpu.memory_space<vmem>>, vector<8x128xf32>
    tpu.vector_store %arg6[%c0_24, %c0_25], %29 {strides = array<i32>} : memref<8x128xf32, #tpu.memory_space<vmem>>, vector<8x128xf32>,
    %c0_i32_26 = arith.constant 0 : i32
    %31 = arith.cmpi eq, %arg1, %c0_i32_26 : i32
    %32 = arith.extui %31 : i1 to i32
    %c0_i32_27 = arith.constant 0 : i32
    %33 = arith.cmpi ne, %32, %c0_i32_27 : i32
    scf.if %33 {
      %c0_28 = arith.constant 0 : index
      %c0_29 = arith.constant 0 : index
      %34 = vector.load %arg5[%c0_28, %c0_29] : memref<8x128xf32, #tpu.memory_space<vmem>>, vector<8x128xf32>
      %cst_30 = arith.constant dense<0.000000e+00> : vector<8xf32>
      %35 = vector.multi_reduction <add>, %34, %cst_30 [1] : vector<8x128xf32> to vector<8xf32>
      %36 = vector.shape_cast %35 : vector<8xf32> to vector<8x1xf32>
      %c0_31 = arith.constant 0 : index
      %c0_32 = arith.constant 0 : index
      %37 = vector.load %arg6[%c0_31, %c0_32] : memref<8x128xf32, #tpu.memory_space<vmem>>, vector<8x128xf32>
      %cst_33 = arith.constant dense<0.000000e+00> : vector<8xf32>
      %38 = vector.multi_reduction <add>, %37, %cst_33 [1] : vector<8x128xf32> to vector<8xf32>
      %39 = vector.shape_cast %38 : vector<8xf32> to vector<8x1xf32>
      %cst_34 = arith.constant 0.000000e+00 : f32
      %40 = vector.broadcast %cst_34 : f32 to vector<8x1xf32>
      %41 = arith.mulf %36, %40 : vector<8x1xf32>
      %42 = arith.addf %41, %39 : vector<8x1xf32>
      %cst_35 = arith.constant 9.99999974E-6 : f32
      %43 = vector.broadcast %cst_35 : f32 to vector<8x1xf32>
      %44 = arith.addf %36, %43 : vector<8x1xf32>
      %cst_36 = arith.constant 9.99999974E-6 : f32
      %45 = vector.broadcast %cst_36 : f32 to vector<8x1xf32>
      %46 = arith.addf %42, %45 : vector<8x1xf32>
      %47 = arith.divf %44, %46 : vector<8x1xf32>
      %c0_37 = arith.constant 0 : index
      %c0_38 = arith.constant 0 : index
      %48 = vector.load %arg4[%c0_37, %c0_38] : memref<8x1xf32, #tpu.memory_space<vmem>>, vector<8x1xf32>
      tpu.vector_store %arg4[%c0_37, %c0_38], %47 {strides = array<i32>} : memref<8x1xf32, #tpu.memory_space<vmem>>, vector<8x1xf32>,
    } else {
    }
    return
  }
  func.func @transform_0(%arg0: i32, %arg1: i32) -> (i32, i32) {
    %c0_i32 = arith.constant 0 : i32
    return %arg0, %arg1 : i32, i32
  }
  func.func @transform_1(%arg0: i32, %arg1: i32) -> (i32, i32) {
    %c0_i32 = arith.constant 0 : i32
    return %arg0, %arg1 : i32, i32
  }
  func.func @transform_2(%arg0: i32, %arg1: i32) -> (i32, i32) {
    %c0_i32 = arith.constant 0 : i32
    %c0_i32_0 = arith.constant 0 : i32
    return %arg0, %c0_i32 : i32, i32
  }
}

</mosaic_0001>

<bundles_post_ra>
// kernel: tversky_loss.1
= control target key start
LH: loop header
LB: loop body
LE: loop exit
PB: predicated region body
PF: predicated region fallthrough
CT: control target
= control target key end

     0   :  { %vm56_vm0 = vcmask 7168   ;;  %s94_s0 = inlined_call_operand.vmem [shape: f32[8,256], index: 0, kind: input, shape index: {}]   ;;  %s95_s1 = inlined_call_operand.vmem [shape: f32[8,256], index: 1, kind: input, shape index: {}]   ;;  %s96_s2 = inlined_call_operand.vmem [shape: f32[8,1], index: 2, kind: output, shape index: {}]  }
   0x1   :  { %v17_v0 = vld [vmem:[%s94_s0] sm:$0xff]  ;;  %v29_v2 = vld [vmem:[%s94_s0 + $0x8] sm:$0xff] }
   0x2   :  { %v18_v1 = vld [vmem:[%s95_s1] sm:$0xff]  ;;  %v24_v4 = vmul.f32 0.3, %v17_v0  ;;  %v30_v6 = vld [vmem:[%s95_s1 + $0x8] sm:$0xff]  ;;  %v36_v8 = vmul.f32 0.3, %v29_v2 }
   0x3   :  { %v20_v3 = vmul.f32 %v18_v1, %v17_v0  ;;  %v25_v5 = vmul.f32 0.7, %v18_v1  ;;  %v32_v7 = vmul.f32 %v30_v6, %v29_v2  ;;  %v37_v9 = vmul.f32 0.7, %v30_v6 }
   0x5   :  { %v26_v10 = vadd.f32 %v25_v5, %v24_v4  ;;  %v33_v11 = vadd.f32 %v32_v7, %v20_v3  ;;  %v38_v12 = vadd.f32 %v37_v9, %v36_v8 }
   0x7   :  { %45 = vadd.xlane.f32.xlu0 %v33_v11  ;;  %v39_v13 = vadd.f32 %v38_v12, %v26_v10 }
   0xb   :  { %48 = vadd.xlane.f32.xlu0 %v39_v13 }
  0x94   :  { %v46_v14 = vpop.xlane.xlu0 %45 }
  0x95   :  { %v50_v15 = vmul.f32 0.0, %v46_v14  ;;  %v52_v19 = vadd.f32 1e-05, %v46_v14 }
  0x98   :  { %v49_v16 = vpop.xlane.xlu0 %48 }
  0x99   :  { %v51_v17 = vadd.f32 %v50_v15, %v49_v16 }
  0x9b   :  { %v53_v18 = vadd.f32 1e-05, %v51_v17 }
  0x9d   :  { %62 = vrcp.f32 %v53_v18 }
  0xa7   :  { %v63_v20 = vpop.eup %62 }
  0xa8   :  { %v55_v21 = vmul.f32 %v63_v20, %v52_v19 }
  0xaa   :  { %57 = vst.msk [vmem:[%s96_s2] sm:$0xff] %vm56_vm0, %v55_v21 }

</bundles_post_ra>
